<compile_context>
chip_gen: v7x
topology: tpu7x:2x2x1
jax: 0.10.0
libtpu: 0.0.40
codegen_flags: <defaults>
</compile_context>

<pallas_src>
import functools

import jax
import jax.numpy as jnp
from jax import lax
from jax.experimental import pallas as pl
from jax.experimental.pallas import tpu as pltpu

BATCH_NORM_EPSILON = 1e-5


def _round_up(x, m):
    return ((x + m - 1) // m) * m


# ----------------------------- Pallas kernels ------------------------------

def _accumulate_and_finalize(y, g_ref, b_ref, scale_ref, shift_ref,
                             sum_acc, sq_acc, n_rows):
    """Accumulate per-channel sum / sum-of-squares of f32 `y` across grid steps;
    on the last step turn them into BN (scale, shift) with one rsqrt/channel.

    NOTE: scale_ref/shift_ref are constant-index (resident) output blocks; only the
    last-step write is meaningful and it is the one written back to HBM — do not
    change this without also changing the output BlockSpecs."""
    i = pl.program_id(0)

    @pl.when(i == 0)
    def _():
        sum_acc[...] = jnp.zeros_like(sum_acc)
        sq_acc[...] = jnp.zeros_like(sq_acc)

    sum_acc[...] += jnp.sum(y, axis=0, keepdims=True)
    sq_acc[...] += jnp.sum(y * y, axis=0, keepdims=True)

    @pl.when(i == pl.num_programs(0) - 1)
    def _():
        inv_n = 1.0 / n_rows
        mean = sum_acc[...] * inv_n
        # E[y^2] - E[y]^2 in f32; adequate at the validated ~1e-2 tolerance.
        # For much larger batches / offsets, switch to centered accumulation.
        var = jnp.maximum(sq_acc[...] * inv_n - mean * mean, 0.0)
        scale = g_ref[...] * lax.rsqrt(var + BATCH_NORM_EPSILON)
        scale_ref[...] = scale
        shift_ref[...] = b_ref[...] - mean * scale


def linear_stats_kernel(x_ref, w_ref, g_ref, b_ref,
                        y_ref, scale_ref, shift_ref,
                        sum_acc, sq_acc, *, n_rows):
    # Layer-0 pass 1: y = x @ W (bf16 operands, f32 accumulate) + BN statistics.
    # Padded rows of x are zero and the Linear has no bias, so padded rows
    # contribute exactly 0 to the statistics -> no row masking needed here.
    y = jnp.dot(x_ref[...], w_ref[...], preferred_element_type=jnp.float32)
    y_ref[...] = y.astype(y_ref.dtype)          # bf16 HBM storage of y
    _accumulate_and_finalize(y, g_ref, b_ref, scale_ref, shift_ref,
                             sum_acc, sq_acc, n_rows)


def bn_act_linear_stats_kernel(y_prev_ref, pscale_ref, pshift_ref,
                               w_ref, g_ref, b_ref,
                               y_ref, scale_ref, shift_ref,
                               sum_acc, sq_acc, *, n_rows, relu, mask_rows):
    # Fused: BN of previous layer (precomputed per-channel scale/shift) [+ReLU]
    #        -> matmul with this layer's W (bf16 operands) -> BN stats of result.
    i = pl.program_id(0)
    tile_m = y_prev_ref.shape[0]

    # Elementwise BN / ReLU stay in f32 (v5e VPU/EUP have no bf16 support).
    h = y_prev_ref[...].astype(jnp.float32) * pscale_ref[...] + pshift_ref[...]
    if relu:
        h = jnp.maximum(h, 0.0)
    if mask_rows:
        # Re-zero padded rows (BN shift makes them non-zero) so they keep
        # contributing 0 to this layer's batch statistics.  Only emitted when
        # padding actually exists; kept as a plain per-step select (tile_m x k
        # VPU work, minor vs. the matmul + stats) for robust lowering instead of
        # a last-tile-only conditional.
        rows = lax.broadcasted_iota(jnp.int32, (tile_m, 1), 0) + i * tile_m
        h = jnp.where(rows < n_rows, h, 0.0)

    y = jnp.dot(h.astype(w_ref.dtype), w_ref[...],
                preferred_element_type=jnp.float32)
    y_ref[...] = y.astype(y_ref.dtype)           # bf16 HBM storage of y
    _accumulate_and_finalize(y, g_ref, b_ref, scale_ref, shift_ref,
                             sum_acc, sq_acc, n_rows)


def bn_apply_kernel(y_ref, scale_ref, shift_ref, o_ref, *, relu):
    # Final epilogue: y * scale + shift (+ optional ReLU), f32 elementwise.
    y = y_ref[...].astype(jnp.float32) * scale_ref[...] + shift_ref[...]
    if relu:
        y = jnp.maximum(y, 0.0)
    o_ref[...] = y.astype(o_ref.dtype)


# ------------------------------ pallas_call glue ----------------------------

def _row_spec(tile_m, n):
    return pl.BlockSpec((tile_m, n), lambda i: (i, 0))


def _resident_spec(r, c):
    # Constant index map -> single-buffer; double-buffering a resident weight
    # only doubles its VMEM footprint with zero pipelining benefit.
    return pl.BlockSpec((r, c), lambda i: (0, 0), pipeline_mode=pl.Buffered(1))


def _vmem_limit(nbytes):
    # Explicit scoped-VMEM budget: 2x estimated working set + headroom, never
    # below the conservative 16 MiB default, clamped to v7x physical VMEM.
    return int(min(max(2 * nbytes + (2 << 20), 16 << 20), 64 << 20))


def linear_bn_stats(x_pad, w, g, b, *, n_rows, tile_m):
    m_pad, k_pad = x_pad.shape
    n_pad = w.shape[1]
    vmem = _vmem_limit(
        k_pad * n_pad * 2                 # resident bf16 W (single buffer)
        + 2 * tile_m * k_pad * 2          # double-buffered bf16 x tile
        + 2 * tile_m * n_pad * 2          # double-buffered bf16 y tile
        + 10 * n_pad * 4)                 # g/b/scale/shift/scratch rows (f32)
    return pl.pallas_call(
        functools.partial(linear_stats_kernel, n_rows=n_rows),
        out_shape=(jax.ShapeDtypeStruct((m_pad, n_pad), jnp.bfloat16),
                   jax.ShapeDtypeStruct((1, n_pad), jnp.float32),
                   jax.ShapeDtypeStruct((1, n_pad), jnp.float32)),
        grid_spec=pltpu.PrefetchScalarGridSpec(
            num_scalar_prefetch=0,
            grid=(m_pad // tile_m,),
            in_specs=[_row_spec(tile_m, k_pad),
                      _resident_spec(k_pad, n_pad),
                      _resident_spec(1, n_pad),
                      _resident_spec(1, n_pad)],
            out_specs=(_row_spec(tile_m, n_pad),
                       pl.BlockSpec((1, n_pad), lambda i: (0, 0)),
                       pl.BlockSpec((1, n_pad), lambda i: (0, 0))),
            scratch_shapes=[pltpu.VMEM((1, n_pad), jnp.float32),
                            pltpu.VMEM((1, n_pad), jnp.float32)]),
        compiler_params=pltpu.CompilerParams(
            # BN statistics accumulate across the row-tile axis.
            dimension_semantics=("arbitrary",),
            vmem_limit_bytes=vmem),
    )(x_pad, w, g, b)


def bn_act_linear_bn_stats(y_prev, pscale, pshift, w, g, b, *,
                           n_rows, tile_m, relu=True, mask_rows=True):
    m_pad, k_pad = y_prev.shape
    n_pad = w.shape[1]
    vmem = _vmem_limit(
        k_pad * n_pad * 2                 # resident bf16 W (single buffer)
        + 2 * tile_m * k_pad * 2          # double-buffered bf16 y_prev tile
        + 2 * tile_m * n_pad * 2          # double-buffered bf16 y tile
        + tile_m * k_pad * 4              # f32 h temporary
        + 10 * (k_pad + n_pad) * 4)       # per-channel rows + scratch (f32)
    return pl.pallas_call(
        functools.partial(bn_act_linear_stats_kernel, n_rows=n_rows,
                          relu=relu, mask_rows=mask_rows),
        out_shape=(jax.ShapeDtypeStruct((m_pad, n_pad), jnp.bfloat16),
                   jax.ShapeDtypeStruct((1, n_pad), jnp.float32),
                   jax.ShapeDtypeStruct((1, n_pad), jnp.float32)),
        grid_spec=pltpu.PrefetchScalarGridSpec(
            num_scalar_prefetch=0,
            grid=(m_pad // tile_m,),
            in_specs=[_row_spec(tile_m, k_pad),
                      _resident_spec(1, k_pad),
                      _resident_spec(1, k_pad),
                      _resident_spec(k_pad, n_pad),
                      _resident_spec(1, n_pad),
                      _resident_spec(1, n_pad)],
            out_specs=(_row_spec(tile_m, n_pad),
                       pl.BlockSpec((1, n_pad), lambda i: (0, 0)),
                       pl.BlockSpec((1, n_pad), lambda i: (0, 0))),
            scratch_shapes=[pltpu.VMEM((1, n_pad), jnp.float32),
                            pltpu.VMEM((1, n_pad), jnp.float32)]),
        compiler_params=pltpu.CompilerParams(
            dimension_semantics=("arbitrary",),
            vmem_limit_bytes=vmem),
    )(y_prev, pscale, pshift, w, g, b)


def bn_apply(y_pad, scale, shift, *, tile_m, relu=False):
    m_pad, n_pad = y_pad.shape
    vmem = _vmem_limit(2 * tile_m * n_pad * (2 + 4) + 8 * n_pad * 4)
    return pl.pallas_call(
        functools.partial(bn_apply_kernel, relu=relu),
        out_shape=jax.ShapeDtypeStruct((m_pad, n_pad), jnp.float32),
        grid_spec=pltpu.PrefetchScalarGridSpec(
            num_scalar_prefetch=0,
            grid=(m_pad // tile_m,),
            in_specs=[_row_spec(tile_m, n_pad),
                      _resident_spec(1, n_pad),
                      _resident_spec(1, n_pad)],
            out_specs=_row_spec(tile_m, n_pad)),
        compiler_params=pltpu.CompilerParams(
            dimension_semantics=("parallel",),
            vmem_limit_bytes=vmem),
    )(y_pad, scale, shift)


# ----------------------------- ContrastiveHead ------------------------------

def prepare_params(params):
    """Pad feature dims to multiples of 128 and cast W to bf16 once (hoisted out
    of the forward path so it is not re-done per call)."""
    prepared = []
    for layer in params:
        w = layer["w"].astype(jnp.float32)
        din, dout = w.shape
        din_p, dout_p = _round_up(din, 128), _round_up(dout, 128)
        w_p = jnp.pad(w, ((0, din_p - din), (0, dout_p - dout))).astype(jnp.bfloat16)
        g_p = jnp.pad(layer["g"].astype(jnp.float32).reshape(1, -1),
                      ((0, 0), (0, dout_p - dout)))
        b_p = jnp.pad(layer["b"].astype(jnp.float32).reshape(1, -1),
                      ((0, 0), (0, dout_p - dout)))
        prepared.append({"w": w_p, "g": g_p, "b": b_p, "out_dim": dout})
    return prepared


def _largest_row_tile(m_pad, tile_m, cap=1024):
    best, t = tile_m, tile_m
    while t <= min(cap, m_pad):
        if m_pad % t == 0:
            best = t
        t += tile_m
    return best


def contrastive_head(x, prepared, *, tile_m=256):
    """Pallas implementation of ContrastiveHead.forward (training-mode BN).

    x: (B, channels_in).  prepared: output of prepare_params — per layer a dict
    with padded bf16 "w" (din_p, dout_p), f32 "g"/"b" (1, dout_p), and "out_dim"."""
    x = x.astype(jnp.float32)
    n_rows, c_in = x.shape

    # Row tile: multiple of 16 (bf16 sublane packing), capped by the padded batch.
    tile_m = max(16, (min(tile_m, _round_up(n_rows, 16)) // 16) * 16)
    m_pad = _round_up(n_rows, tile_m)
    c_pad = _round_up(c_in, 128)
    x_pad = jnp.pad(x, ((0, m_pad - n_rows), (0, c_pad - c_in))).astype(jnp.bfloat16)
    mask_rows = m_pad != n_rows

    # layer 0: tiled matmul + BN statistics.
    l0 = prepared[0]
    y, scale, shift = linear_bn_stats(x_pad, l0["w"], l0["g"], l0["b"],
                                      n_rows=n_rows, tile_m=tile_m)

    # layers 1..L-1: fuse (BN+ReLU of previous layer) with this layer's
    # matmul + BN statistics -> no HBM round trip of normalized activations.
    for layer in prepared[1:]:
        y, scale, shift = bn_act_linear_bn_stats(
            y, scale, shift, layer["w"], layer["g"], layer["b"],
            n_rows=n_rows, tile_m=tile_m, relu=True, mask_rows=mask_rows)

    # final BN of the last layer (no ReLU); memory-bound, so use a bigger tile.
    apply_tile = _largest_row_tile(m_pad, tile_m, cap=1024)
    out_pad = bn_apply(y, scale, shift, tile_m=apply_tile, relu=False)
    return out_pad[:n_rows, :prepared[-1]["out_dim"]]


# ----------------------------- pure-JAX references --------------------------

def ref_forward(x, params, *, mixed=False):
    """Reference forward.  mixed=True mirrors the kernel's bf16 MXU operands and
    bf16 storage of the intermediate y (stats still from the f32 matmul result)."""
    h = x.astype(jnp.float32)
    n = len(params)
    for i, p in enumerate(params):
        w = p["w"].astype(jnp.float32)
        if mixed:
            y = jnp.dot(h.astype(jnp.bfloat16), w.astype(jnp.bfloat16),
                        preferred_element_type=jnp.float32)
        else:
            y = h @ w
        mean = y.mean(axis=0, keepdims=True)
        var = ((y - mean) ** 2).mean(axis=0, keepdims=True)
        scale = p["g"] * lax.rsqrt(var + BATCH_NORM_EPSILON)
        shift = p["b"] - mean * scale
        if mixed:
            y = y.astype(jnp.bfloat16).astype(jnp.float32)
        y = y * scale + shift
        if i != n - 1:
            y = jnp.maximum(y, 0.0)
        h = y
    return h


# --------------------------------- main -------------------------------------

def make_params(key, channels_in, out_dim=128, num_layers=3):
    params = []
    keys = jax.random.split(key, num_layers * 3)
    for i in range(num_layers):
        last = (i == num_layers - 1)
        dout = out_dim if last else channels_in
        kw, kg, kb = keys[3 * i], keys[3 * i + 1], keys[3 * i + 2]
        w = 0.2 * jax.random.normal(kw, (channels_in, dout), jnp.float32)
        g = 1.0 + 0.1 * jax.random.normal(kg, (dout,), jnp.float32)
        if last:
            b = jnp.zeros((dout,), jnp.float32)  # nn.init.zeros_(bn.bias)
        else:
            b = 0.05 * jax.random.normal(kb, (dout,), jnp.float32)
        params.append({"w": w, "g": g, "b": b})
    return params


if __name__ == "__main__":
    key = jax.random.PRNGKey(0)
    kx, kp = jax.random.split(key)

    B, C_IN, OUT_DIM, NUM_LAYERS = 112, 32, 128, 3

    x = jax.random.normal(kx, (B, C_IN), jnp.float32)
    params = make_params(kp, C_IN, OUT_DIM, NUM_LAYERS)
    prepared = prepare_params(params)   # pad + bf16-cast weights once

    # tile_m=32 at this toy size exercises multi-tile statistics accumulation
    # and padded-row masking (112 rows -> 4 tiles of 32, 16 padded rows).
    out = contrastive_head(x, prepared, tile_m=32)
    out = jax.block_until_ready(out)
    assert out.shape == (B, OUT_DIM), out.shape

    # Tight check against a reference that mirrors the kernel's bf16 mixed precision.
    ref_mixed = jax.block_until_ready(ref_forward(x, params, mixed=True))
    err_mixed = float(jnp.max(jnp.abs(out - ref_mixed)))
    assert jnp.allclose(out, ref_mixed, rtol=2e-2, atol=2e-2), err_mixed

    # Loose sanity check against the pure-f32 module semantics.
    ref_full = jax.block_until_ready(ref_forward(x, params, mixed=False))
    err_full = float(jnp.max(jnp.abs(out - ref_full)))
    assert jnp.allclose(out, ref_full, rtol=1e-1, atol=1e-1), err_full

    print("KERNEL_OK")
</pallas_src>

<mosaic_0001>
module attributes {stable_mosaic.version = 11 : i64} {
  func.func @linear_stats_kernel(%arg0: i32, %arg1: memref<32x128xbf16, #tpu.memory_space<vmem>>, %arg2: memref<128x128xbf16, #tpu.memory_space<vmem>>, %arg3: memref<1x128xf32, #tpu.memory_space<vmem>>, %arg4: memref<1x128xf32, #tpu.memory_space<vmem>>, %arg5: memref<32x128xbf16, #tpu.memory_space<vmem>>, %arg6: memref<1x128xf32, #tpu.memory_space<vmem>>, %arg7: memref<1x128xf32, #tpu.memory_space<vmem>>, %arg8: memref<1x128xf32, #tpu.memory_space<vmem>>, %arg9: memref<1x128xf32, #tpu.memory_space<vmem>>) attributes {dimension_semantics = [#tpu.dimension_semantics<arbitrary>], iteration_bounds = array<i64: 4>, scalar_prefetch = 0 : i64, scratch_operands = 2 : i64, tpu.core_type = #tpu.core_type<tc>, window_params = [{transform_indices = @transform_0, window_bounds = array<i64: 32, 128>}, {pipeline_mode = #tpu.pipeline_mode<synchronous>, transform_indices = @transform_1, window_bounds = array<i64: 128, 128>}, {pipeline_mode = #tpu.pipeline_mode<synchronous>, transform_indices = @transform_2, window_bounds = array<i64: 1, 128>}, {pipeline_mode = #tpu.pipeline_mode<synchronous>, transform_indices = @transform_3, window_bounds = array<i64: 1, 128>}, {transform_indices = @transform_4, window_bounds = array<i64: 32, 128>}, {pipeline_mode = #tpu.pipeline_mode<synchronous>, transform_indices = @transform_5, window_bounds = array<i64: 1, 128>}, {pipeline_mode = #tpu.pipeline_mode<synchronous>, transform_indices = @transform_6, window_bounds = array<i64: 1, 128>}]} {
    %c0 = arith.constant 0 : index
    %c0_0 = arith.constant 0 : index
    %0 = vector.load %arg1[%c0, %c0_0] : memref<32x128xbf16, #tpu.memory_space<vmem>>, vector<32x128xbf16>
    %c0_1 = arith.constant 0 : index
    %c0_2 = arith.constant 0 : index
    %1 = vector.load %arg2[%c0_1, %c0_2] : memref<128x128xbf16, #tpu.memory_space<vmem>>, vector<128x128xbf16>
    %cst = arith.constant dense<0.000000e+00> : vector<32x128xf32>
    %2 = tpu.matmul %0, %1, %cst {dimension_numbers = #tpu.dot_dimension_numbers<[1], [0], [0], [1], [0, 0, 1, 1], [], []>} : vector<32x128xbf16>, vector<128x128xbf16>, vector<32x128xf32> -> vector<32x128xf32>
    %3 = arith.truncf %2 : vector<32x128xf32> to vector<32x128xbf16>
    %c0_3 = arith.constant 0 : index
    %c0_4 = arith.constant 0 : index
    %4 = vector.load %arg5[%c0_3, %c0_4] : memref<32x128xbf16, #tpu.memory_space<vmem>>, vector<32x128xbf16>
    tpu.vector_store %arg5[%c0_3, %c0_4], %3 {strides = array<i32>} : memref<32x128xbf16, #tpu.memory_space<vmem>>, vector<32x128xbf16>,
    %c0_i32 = arith.constant 0 : i32
    %5 = arith.cmpi eq, %arg0, %c0_i32 : i32
    %6 = arith.extui %5 : i1 to i32
    %c0_i32_5 = arith.constant 0 : i32
    %7 = arith.cmpi ne, %6, %c0_i32_5 : i32
    scf.if %7 {
      %cst_17 = arith.constant 0.000000e+00 : f32
      %22 = vector.broadcast %cst_17 : f32 to vector<1x128xf32>
      %c0_18 = arith.constant 0 : index
      %c0_19 = arith.constant 0 : index
      %23 = vector.load %arg8[%c0_18, %c0_19] : memref<1x128xf32, #tpu.memory_space<vmem>>, vector<1x128xf32>
      tpu.vector_store %arg8[%c0_18, %c0_19], %22 {strides = array<i32>} : memref<1x128xf32, #tpu.memory_space<vmem>>, vector<1x128xf32>,
      %cst_20 = arith.constant 0.000000e+00 : f32
      %24 = vector.broadcast %cst_20 : f32 to vector<1x128xf32>
      %c0_21 = arith.constant 0 : index
      %c0_22 = arith.constant 0 : index
      %25 = vector.load %arg9[%c0_21, %c0_22] : memref<1x128xf32, #tpu.memory_space<vmem>>, vector<1x128xf32>
      tpu.vector_store %arg9[%c0_21, %c0_22], %24 {strides = array<i32>} : memref<1x128xf32, #tpu.memory_space<vmem>>, vector<1x128xf32>,
    } else {
    }
    %c0_6 = arith.constant 0 : index
    %c0_7 = arith.constant 0 : index
    %8 = vector.load %arg8[%c0_6, %c0_7] : memref<1x128xf32, #tpu.memory_space<vmem>>, vector<1x128xf32>
    %cst_8 = arith.constant dense<0.000000e+00> : vector<128xf32>
    %9 = vector.multi_reduction <add>, %2, %cst_8 [0] : vector<32x128xf32> to vector<128xf32>
    %10 = vector.shape_cast %9 : vector<128xf32> to vector<1x128xf32>
    %11 = arith.addf %8, %10 : vector<1x128xf32>
    %c0_9 = arith.constant 0 : index
    %c0_10 = arith.constant 0 : index
    %12 = vector.load %arg8[%c0_9, %c0_10] : memref<1x128xf32, #tpu.memory_space<vmem>>, vector<1x128xf32>
    tpu.vector_store %arg8[%c0_9, %c0_10], %11 {strides = array<i32>} : memref<1x128xf32, #tpu.memory_space<vmem>>, vector<1x128xf32>,
    %c0_11 = arith.constant 0 : index
    %c0_12 = arith.constant 0 : index
    %13 = vector.load %arg9[%c0_11, %c0_12] : memref<1x128xf32, #tpu.memory_space<vmem>>, vector<1x128xf32>
    %14 = arith.mulf %2, %2 : vector<32x128xf32>
    %cst_13 = arith.constant dense<0.000000e+00> : vector<128xf32>
    %15 = vector.multi_reduction <add>, %14, %cst_13 [0] : vector<32x128xf32> to vector<128xf32>
    %16 = vector.shape_cast %15 : vector<128xf32> to vector<1x128xf32>
    %17 = arith.addf %13, %16 : vector<1x128xf32>
    %c0_14 = arith.constant 0 : index
    %c0_15 = arith.constant 0 : index
    %18 = vector.load %arg9[%c0_14, %c0_15] : memref<1x128xf32, #tpu.memory_space<vmem>>, vector<1x128xf32>
    tpu.vector_store %arg9[%c0_14, %c0_15], %17 {strides = array<i32>} : memref<1x128xf32, #tpu.memory_space<vmem>>, vector<1x128xf32>,
    %c3_i32 = arith.constant 3 : i32
    %19 = arith.cmpi eq, %arg0, %c3_i32 : i32
    %20 = arith.extui %19 : i1 to i32
    %c0_i32_16 = arith.constant 0 : i32
    %21 = arith.cmpi ne, %20, %c0_i32_16 : i32
    scf.if %21 {
      %c0_17 = arith.constant 0 : index
      %c0_18 = arith.constant 0 : index
      %22 = vector.load %arg8[%c0_17, %c0_18] : memref<1x128xf32, #tpu.memory_space<vmem>>, vector<1x128xf32>
      %cst_19 = arith.constant 0.00892857183 : f32
      %23 = vector.broadcast %cst_19 : f32 to vector<1x128xf32>
      %24 = arith.mulf %22, %23 : vector<1x128xf32>
      %c0_20 = arith.constant 0 : index
      %c0_21 = arith.constant 0 : index
      %25 = vector.load %arg9[%c0_20, %c0_21] : memref<1x128xf32, #tpu.memory_space<vmem>>, vector<1x128xf32>
      %cst_22 = arith.constant 0.00892857183 : f32
      %26 = vector.broadcast %cst_22 : f32 to vector<1x128xf32>
      %27 = arith.mulf %25, %26 : vector<1x128xf32>
      %28 = arith.mulf %24, %24 : vector<1x128xf32>
      %29 = arith.subf %27, %28 : vector<1x128xf32>
      %cst_23 = arith.constant 0.000000e+00 : f32
      %30 = vector.broadcast %cst_23 : f32 to vector<1x128xf32>
      %31 = arith.maximumf %29, %30 : vector<1x128xf32>
      %c0_24 = arith.constant 0 : index
      %c0_25 = arith.constant 0 : index
      %32 = vector.load %arg3[%c0_24, %c0_25] : memref<1x128xf32, #tpu.memory_space<vmem>>, vector<1x128xf32>
      %cst_26 = arith.constant 9.99999974E-6 : f32
      %33 = vector.broadcast %cst_26 : f32 to vector<1x128xf32>
      %34 = arith.addf %31, %33 : vector<1x128xf32>
      %35 = math.rsqrt %34 : vector<1x128xf32>
      %36 = arith.mulf %32, %35 : vector<1x128xf32>
      %c0_27 = arith.constant 0 : index
      %c0_28 = arith.constant 0 : index
      %37 = vector.load %arg6[%c0_27, %c0_28] : memref<1x128xf32, #tpu.memory_space<vmem>>, vector<1x128xf32>
      tpu.vector_store %arg6[%c0_27, %c0_28], %36 {strides = array<i32>} : memref<1x128xf32, #tpu.memory_space<vmem>>, vector<1x128xf32>,
      %c0_29 = arith.constant 0 : index
      %c0_30 = arith.constant 0 : index
      %38 = vector.load %arg4[%c0_29, %c0_30] : memref<1x128xf32, #tpu.memory_space<vmem>>, vector<1x128xf32>
      %39 = arith.mulf %24, %36 : vector<1x128xf32>
      %40 = arith.subf %38, %39 : vector<1x128xf32>
      %c0_31 = arith.constant 0 : index
      %c0_32 = arith.constant 0 : index
      %41 = vector.load %arg7[%c0_31, %c0_32] : memref<1x128xf32, #tpu.memory_space<vmem>>, vector<1x128xf32>
      tpu.vector_store %arg7[%c0_31, %c0_32], %40 {strides = array<i32>} : memref<1x128xf32, #tpu.memory_space<vmem>>, vector<1x128xf32>,
    } else {
    }
    return
  }
  func.func @transform_0(%arg0: i32) -> (i32, i32) {
    %c0_i32 = arith.constant 0 : i32
    %c0_i32_0 = arith.constant 0 : i32
    return %arg0, %c0_i32 : i32, i32
  }
  func.func @transform_1(%arg0: i32) -> (i32, i32) {
    %c0_i32 = arith.constant 0 : i32
    %c0_i32_0 = arith.constant 0 : i32
    %c0_i32_1 = arith.constant 0 : i32
    return %c0_i32, %c0_i32_0 : i32, i32
  }
  func.func @transform_2(%arg0: i32) -> (i32, i32) {
    %c0_i32 = arith.constant 0 : i32
    %c0_i32_0 = arith.constant 0 : i32
    %c0_i32_1 = arith.constant 0 : i32
    return %c0_i32, %c0_i32_0 : i32, i32
  }
  func.func @transform_3(%arg0: i32) -> (i32, i32) {
    %c0_i32 = arith.constant 0 : i32
    %c0_i32_0 = arith.constant 0 : i32
    %c0_i32_1 = arith.constant 0 : i32
    return %c0_i32, %c0_i32_0 : i32, i32
  }
  func.func @transform_4(%arg0: i32) -> (i32, i32) {
    %c0_i32 = arith.constant 0 : i32
    %c0_i32_0 = arith.constant 0 : i32
    return %arg0, %c0_i32 : i32, i32
  }
  func.func @transform_5(%arg0: i32) -> (i32, i32) {
    %c0_i32 = arith.constant 0 : i32
    %c0_i32_0 = arith.constant 0 : i32
    %c0_i32_1 = arith.constant 0 : i32
    return %c0_i32, %c0_i32_0 : i32, i32
  }
  func.func @transform_6(%arg0: i32) -> (i32, i32) {
    %c0_i32 = arith.constant 0 : i32
    %c0_i32_0 = arith.constant 0 : i32
    %c0_i32_1 = arith.constant 0 : i32
    return %c0_i32, %c0_i32_0 : i32, i32
  }
}

</mosaic_0001>

<bundles_post_ra>
// kernel: tpu_custom_call.1
= control target key start
LH: loop header
LB: loop body
LE: loop exit
PB: predicated region body
PF: predicated region fallthrough
CT: control target
= control target key end

     0   :  { %12 = vsyncpa [#allocation5], 0  ;;  %s1286_s0 = inlined_call_operand.hbm [shape: bf16[128,128], index: 0, kind: input, shape index: {}]   ;;  %s1287_s1 = inlined_call_operand.hbm [shape: bf16[128,128], index: 1, kind: input, shape index: {}]   ;;  %s1288_s2 = inlined_call_operand.vmem [shape: f32[1,128], index: 2, kind: input, shape index: {}]   ;;  %s1289_s3 = inlined_call_operand.vmem [shape: f32[1,128], index: 3, kind: input, shape index: {}]   ;;  %s1290_s4 = inlined_call_operand.hbm [shape: bf16[128,128], index: 4, kind: output, shape index: {0}]   ;;  %s1291_s5 = inlined_call_operand.hbm [shape: f32[1,128], index: 5, kind: output, shape index: {1}]   ;;  %s1292_s6 = inlined_call_operand.hbm [shape: f32[1,128], index: 6, kind: output, shape index: {2}]  }
   0x1   :  { %14 = vsyncpa [#allocation5 + $0x1], 0 }
   0x2   :  { %15 = vsyncpa [#allocation8], 0 }
   0x3   :  { %16 = vsyncpa [#allocation6], 0 }
   0x4   :  { %18 = vsyncpa [#allocation6 + $0x1], 0 }
   0x5   :  { %19 = vsyncpa [#allocation11], 0  ;;  %s1029_s21 = smov 0   ;;  %s1031_s22 = smov 0  }
   0x6   :  { %s1033_s23 = smov 0   ;;  %s1035_s24 = smov 0  }
   0x7 LB: > { %s1050_s25 = sadd.s32 4294967295, %s982_s24   ;;  %s627_s26 = sadd.s32 4294967294, %s982_s24   ;;  %s982_s24 = sphi %s1035_s24, %s1318_s24   ;;  %s978_s23 = sphi %s1033_s23, %s1317_s23   ;;  %s974_s22 = sphi %s1031_s22, %s1316_s22   ;;  %s970_s21 = sphi %s1029_s21, %s1315_s21  }
   0x8   : > { %p45_p0 = scmp.ne.s32.totalorder %s974_s22, %s970_s21  ;;  %p1293_p1 = scmp.eq.s32.totalorder %s1050_s25, 0 }
   0x9   : > { %p138_p3 = scmp.eq.s32.totalorder %s627_s26, 3  ;;  %p628_p5 = scmp.ge.s32.totalorder %s982_s24, 1 }
   0xa   : > { %p1059_p4 = por %p1293_p1, %p45_p0  ;;  %p187_p7 = scmp.lt.s32.totalorder %s982_s24, 5 }
   0xb   : > { %p1064_p6 = por %p138_p3, %p45_p0  ;;  %s984_s30 = smov [#allocation7]  }
   0xc   : > { %s1296_s27 = scalar_select %p1059_p4, 1, 0 }
   0xd   : > { %s1297_s28 = scalar_select %p1064_p6, 1, 0 }
   0xe   : > { %p1070_p9 = pnand %p628_p5, %p187_p7  ;;  %s199_s7 = sshll.u32 %s984_s30, 4  ;;  %s200_s7 = int_to_ptr.vmem [resolvable:$true] %s199_s7 }
   0xf   : > { %s1083_s9 = sadd.s32 1, %s982_s24   ;;  %s32_s10 = sadd.s32 1, %s978_s23 }
  0x10   : > { %s1298_s29 = scalar_select %p1070_p9, 1, 0 }
  0x11   : > { %p726_p10 = pneg %p1070_p9  ;;  %s29_s11 = ssub.s32 %s982_s24, %s1083_s9 }
  0x12   : > { %s798_s14 = scalar_lea.hbm %s1287_s1, 1024 }
  0x13   : > { %p1078_p11 = pnand %p726_p10, %p1293_p1  ;;  %p799_p12 = scmp.ne.s32.totalorder %s1287_s1, %s798_s14 }
  0x14   : > { %p805_p5 = scmp.lt.u32.totalorder %s798_s14, %s1287_s1 }
  0x15   : > { %p800_p13 = pneg %p1078_p11 }
  0x17   : > { %p801_p0 = pnand %p800_p13, %p799_p12 }
  0x19   : > { %p802_p3 = pneg %p801_p0 }
  0x1b   : > { %p807_p7 = pnand %p805_p5, %p802_p3 }
  0x1d   : > { %810 = shalt.err (!%p807_p7)
}
  0x1e   : > { %s811_s19 = scalar_lea.vmem %s200_s7, 1024  ;;  %p819_p2 = scmp.lt.s32.totalorder %s200_s7, %s200_s7 }
  0x1f   : > { %p812_p10 = scmp.ne.s32.totalorder %s200_s7, %s811_s19  ;;  %p820_p6 = scmp.lt.s32.totalorder %s811_s19, %s811_s19 }
  0x21   : > { %p814_p8 = pnand %p812_p10, %p800_p13  ;;  %p821_p4 = por %p820_p6, %p819_p2 }
  0x23   : > { %p815_p1 = pneg %p814_p8 }
  0x25   : > { %p822_p9 = pnand %p821_p4, %p815_p1 }
  0x27   : > { %825 = shalt.err (!%p822_p9)
}
  0x28   : > { %s985_s20 = smov 64   ;;  %s986_s26 = smov 4  }
  0x29   : > { %729 = dma.hbm_to_vmem [thread:$0]  (!%p1078_p11), %s1287_s1, 1024, %s200_s7, [#allocation8], %s985_s20, %s985_s20, %s986_s26  }
  0x2a   : > { %p30_p1 = scmp.eq.s32.totalorder %s29_s11, 0  ;;  %p39_p2 = scmp.ne.s32.totalorder %s978_s23, %s974_s22 }
  0x2b   : > { %p40_p4 = scmp.eq.s32.totalorder %s982_s24, 0  ;;  %p739_p6 = scmp.lt.s32.totalorder %s982_s24, 4 }
  0x2c   : > { %s1112_s13 = scalar_select %p30_p1, %s978_s23, %s32_s10  }
  0x2d   : > { %p41_p8 = por %p40_p4, %p39_p2  ;;  %p1300_p9 = scmp.eq.s32.totalorder %s1050_s25, 3 }
  0x2e   : > { %s219_s8 = sand.u32 1, %s978_s23   ;;  %s663_s15 = sshll.u32 %s982_s24, 8 }
  0x2f   : > { %p1116_p12 = por %p1300_p9, %p39_p2  ;;  %s631_s16 = sshll.u32 %s219_s8, 4 }
  0x30   : > { %s1125_s19 = scalar_lea.hbm %s1286_s0, %s663_s15  ;;  %s223_s7 = scalar_lea.vmem [#allocation4], %s631_s16 }
  0x31   : > { %s230_s10 = sshll.u32 %s223_s7, 4  ;;  %p1127_p11 = pnand %p739_p6, %p41_p8  ;;  %s1131_s10 = int_to_ptr.vmem [resolvable:$true] %s230_s10 }
  0x32   : > { %s1133_s30 = scalar_lea.sflag [#allocation5], %s219_s8  ;;  %s826_s12 = scalar_lea.hbm %s1125_s19, 256 }
  0x33   : > { %p827_p13 = scmp.ne.s32.totalorder %s1125_s19, %s826_s12  ;;  %p828_p0 = pneg %p1127_p11 }
  0x34   : > { %s831_s17 = scalar_lea.hbm %s1286_s0, 1024  ;;  %p832_p7 = scmp.lt.u32.totalorder %s1125_s19, %s1286_s0 }
  0x35   : > { %p829_p3 = pnand %p828_p0, %p827_p13  ;;  %p833_p10 = scmp.lt.u32.totalorder %s831_s17, %s826_s12 }
  0x36   : > { %p835_p2 = scmp.lt.u32.totalorder %s826_s12, %s1125_s19 }
  0x37   : > { %p830_p5 = pneg %p829_p3  ;;  %p834_p1 = por %p833_p10, %p832_p7 }
  0x39   : > { %p836_p4 = por %p835_p2, %p834_p1 }
  0x3b   : > { %p837_p6 = pnand %p836_p4, %p830_p5 }
  0x3d   : > { %840 = shalt.err (!%p837_p6)
}
  0x3e   : > { %s841_s8 = scalar_lea.vmem %s1131_s10, 256  ;;  %s987_s15 = smov [#allocation4]  }
  0x3f   : > { %p842_p8 = scmp.ne.s32.totalorder %s1131_s10, %s841_s8  ;;  %s846_s16 = sshll.u32 %s987_s15, 4  ;;  %s847_s16 = int_to_ptr.vmem [resolvable:$false] %s846_s16 }
  0x40   : > { %s848_s18 = scalar_lea.vmem %s847_s16, 512  ;;  %p849_p3 = scmp.lt.s32.totalorder %s1131_s10, %s847_s16 }
  0x41   : > { %p844_p9 = pnand %p842_p8, %p828_p0  ;;  %p850_p7 = scmp.lt.s32.totalorder %s848_s18, %s841_s8 }
  0x43   : > { %p845_p13 = pneg %p844_p9  ;;  %p851_p10 = por %p850_p7, %p849_p3 }
  0x45   : > { %p852_p1 = pnand %p851_p10, %p845_p13 }
  0x47   : > { %855 = shalt.err (!%p852_p1)
}
  0x48   : > { %733 = dma.hbm_to_vmem [thread:$0]  (!%p1127_p11), %s1125_s19, 256, %s1131_s10, %s1133_s30, %s985_s20, %s985_s20, %s986_s26  }
  0x49   : > { %p1303_p0 = scmp.ne.s32.totalorder %s1298_s29, 0 }
  0x4a   : > { %s1167_s12 = sand.u32 (!%p1303_p0), 1, %s974_s22   ;;  %p1304_p5 = scmp.ne.s32.totalorder (!%p1303_p0), %s1296_s27, 0 }
  0x4b   : > { %242 = sbr.rel (%p1303_p0) target bundleno = 468 (0x1d4), region = 36  ;;  %s635_s17 = sshll.u32 (!%p1303_p0), %s1167_s12, 4 }
  0x4c   : > { %s245_s7 = scalar_lea.sflag (!%p1303_p0), [#allocation5], %s1167_s12  ;;  %s248_s11 = scalar_lea.vmem (!%p1303_p0), [#allocation4], %s635_s17 }
  0x52   : > { %953 = dma.done.wait (%p1304_p5), %s245_s7, 256  }
  0x53   : > { %955 = vsyncadd (%p1304_p5), %s245_s7, 4294967040  ;;  %p1305_p11 = scmp.eq.s32.totalorder %s1050_s25, 0 }
  0x55   : > { %957 = dma.done.wait (%p1305_p11), [#allocation8], 1024   ;;  %p1306_p2 = pmov %p1305_p11 }
  0x56   : > { %v786_v0 = vld [vmem:[#allocation7] sm:$0xff]   ;;  %v787_v1 = vld [vmem:[#allocation7 + $0x8] sm:$0xff]   ;;  %v788_v2 = vld [vmem:[#allocation7 + $0x10] sm:$0xff]   ;;  %s1183_s27 = scalar_lea.vmem [#allocation9], %s635_s17  ;;  %p1307_p4 = scmp.ne.s32.totalorder %s1050_s25, 0 }
  0x57   : > { %959 = vsyncadd (%p1306_p2), [#allocation8], 4294966272  ;;  %690 = vmatprep.subr.bf16.mxu0 %v786_v0  ;;  %v789_v3 = vld [vmem:[#allocation7 + $0x18] sm:$0xff]   ;;  %v794_v4 = vld [vmem:[%s248_s11] sm:$0xff]   ;;  %v988_v16 = vmov (!%p1307_p4), 0.0  }
  0x58   : > { %691 = vmatpush3.bf16.msra.mxu0 %v786_v0  ;;  %706 = vmatprep.mubr.bf16.mxu0 %v794_v4  ;;  %v790_v5 = vld [vmem:[#allocation7 + $0x20] sm:$0xff]   ;;  %v791_v6 = vld [vmem:[#allocation7 + $0x28] sm:$0xff]   ;;  %v792_v7 = vld [vmem:[#allocation7 + $0x30] sm:$0xff]   ;;  %437 = vst [vmem:[#allocation2] sm:$0x1] (!%p1307_p4), %v988_v16 }
  0x59   : > { %692 = vmatprep.subr.bf16.mxu0 %v787_v1  ;;  %v793_v8 = vld [vmem:[#allocation7 + $0x38] sm:$0xff]   ;;  %438 = vst [vmem:[#allocation3] sm:$0x1] (!%p1307_p4), %v988_v16 }
  0x5a   : > { %v795_v9 = vld [vmem:[%s248_s11 + $0x8] sm:$0xff]  }
  0x5c   : > { %693 = vmatpush3.bf16.msra.mxu0 %v787_v1 }
  0x5d   : > { %694 = vmatprep.subr.bf16.mxu0 %v788_v2 }
  0x60   : > { %695 = vmatpush3.bf16.msra.mxu0 %v788_v2 }
  0x61   : > { %696 = vmatprep.subr.bf16.mxu0 %v789_v3 }
  0x64   : > { %697 = vmatpush3.bf16.msra.mxu0 %v789_v3 }
  0x65   : > { %698 = vmatprep.subr.bf16.mxu0 %v790_v5 }
  0x68   : > { %699 = vmatpush3.bf16.msra.mxu0 %v790_v5 }
  0x69   : > { %700 = vmatprep.subr.bf16.mxu0 %v791_v6 }
  0x6c   : > { %701 = vmatpush3.bf16.msra.mxu0 %v791_v6 }
  0x6d   : > { %702 = vmatprep.subr.bf16.mxu0 %v792_v7 }
  0x70   : > { %703 = vmatpush3.bf16.msra.mxu0 %v792_v7 }
  0x71   : > { %704 = vmatprep.subr.bf16.mxu0 %v793_v8 }
  0x74   : > { %705 = vmatpush3.bf16.msra.mxu0 %v793_v8 }
  0x77   : > { %707 = vmatmul.mubr.bf16.vlgmr.msra.gmra.mrb[0].mxu0 %v795_v9 }
 0x14a   : > { %v708_v10 = vpop.f32.mrb[0].mxu0  ;;  %436 = sbr.rel (%p1307_p4) target bundleno = 337 (0x151), region = 48 }
 0x14b   : > { %v398_v11 = vpop.f32.mrb[1].mxu0 }
 0x14c   : > { %v709_v12 = vpop.f32.mrb[2].mxu0 }
 0x14d   : > { %v677_v13 = vpack.c.bf16 %v709_v12, %v708_v10  ;;  %v401_v14 = vpop.f32.mrb[3].mxu0 }
 0x14e   : > { %v672_v15 = vpack.c.bf16 %v401_v14, %v398_v11 }
 0x14f   : > { %679 = vst [vmem:[%s1183_s27 + $0x8] sm:$0xff] %v677_v13  }
 0x150   : > { %673 = vst [vmem:[%s1183_s27] sm:$0xff] %v672_v15  }
 0x151 PF: > { %v440_v17 = vadd.f32 %v401_v14, %v398_v11  ;;  %v452_v18 = vmul.f32 %v398_v11, %v398_v11  ;;  %v453_v19 = vmul.f32 %v401_v14, %v401_v14  ;;  %v454_v20 = vmul.f32 %v708_v10, %v708_v10  ;;  %v439_v36 = vld [vmem:[#allocation2] sm:$0x1]  ;;  %v451_v39 = vld [vmem:[#allocation3] sm:$0x1]  ;;  %p653_p6 = scmp.ne.s32.totalorder %s1050_s25, 3 }
 0x152   : > { %v455_v22 = vmul.f32 %v709_v12, %v709_v12  ;;  %v478_v51 = vld [vmem:[%s1288_s2] sm:$0x1] (!%p653_p6) }
 0x153   : > { %v441_v21 = vadd.f32 %v708_v10, %v440_v17  ;;  %v456_v23 = vadd.f32 %v453_v19, %v452_v18  ;;  %v483_v54 = vld [vmem:[%s1289_s3] sm:$0x1] (!%p653_p6) }
 0x155   : > { %v442_v24 = vadd.f32 %v709_v12, %v441_v21  ;;  %v457_v25 = vadd.f32 %v456_v23, %v454_v20 }
 0x157   : > { %v443_v26 = vrot.slane %v442_v24, 4  ;;  %v458_v27 = vadd.f32 %v457_v25, %v455_v22 }
 0x159   : > { %v444_v28 = vadd.f32 %v443_v26, %v442_v24  ;;  %v459_v29 = vrot.slane %v458_v27, 4 }
 0x15b   : > { %v445_v30 = vrot.slane %v444_v28, 2  ;;  %v460_v31 = vadd.f32 %v459_v29, %v458_v27 }
 0x15d   : > { %v446_v32 = vadd.f32 %v445_v30, %v444_v28  ;;  %v461_v33 = vrot.slane %v460_v31, 2 }
 0x15f   : > { %v447_v34 = vrot.slane %v446_v32, 1  ;;  %v462_v35 = vadd.f32 %v461_v33, %v460_v31 }
 0x161   : > { %v448_v37 = vadd.f32 %v447_v34, %v446_v32  ;;  %v463_v38 = vrot.slane %v462_v35, 1  ;;  %470 = sbr.rel (%p653_p6) target bundleno = 393 (0x189), region = 52 }
 0x163   : > { %v449_v40 = vadd.f32 %v448_v37, %v439_v36  ;;  %v464_v41 = vadd.f32 %v463_v38, %v462_v35 }
 0x165   : > { %450 = vst [vmem:[#allocation2] sm:$0x1] %v449_v40  ;;  %v465_v42 = vadd.f32 %v464_v41, %v451_v39 }
 0x167   : > { %466 = vst [vmem:[#allocation3] sm:$0x1] %v465_v42 }
 0x16c   : > { %v471_v43 = vld [vmem:[#allocation2] sm:$0x1] }
 0x16d   : > { %v472_v45 = vmul.f32 0.008928572, %v471_v43 }
 0x16e   : > { %v473_v44 = vld [vmem:[#allocation3] sm:$0x1] }
 0x16f   : > { %v474_v46 = vmul.f32 0.008928572, %v473_v44  ;;  %v475_v47 = vmul.f32 %v472_v45, %v472_v45 }
 0x171   : > { %v476_v48 = vsub.f32 %v474_v46, %v475_v47 }
 0x173   : > { %v477_v49 = vmax.f32 %v476_v48, 0.0 }
 0x175   : > { %v479_v50 = vadd.f32 1e-05, %v477_v49 }
 0x177   : > { %796 = vrsqrt.f32 %v479_v50 }
 0x181   : > { %v797_v52 = vpop.eup %796 }
 0x182   : > { %v481_v53 = vmul.f32 %v797_v52, %v478_v51 }
 0x184   : > { %482 = vst [vmem:[#allocation10] sm:$0x1] %v481_v53  ;;  %v484_v55 = vmul.f32 %v481_v53, %v472_v45 }
 0x186   : > { %v485_v56 = vsub.f32 %v483_v54, %v484_v55 }
 0x188   : > { %486 = vst [vmem:[#allocation12] sm:$0x1] %v485_v56 }
 0x189 PF: > { %s989_s10 = smov [#allocation10]   ;;  %s668_s8 = sshll.u32 %s1050_s25, 8 }
 0x18a   : > { %s515_s30 = sshll.u32 %s989_s10, 4  ;;  %s1200_s18 = scalar_lea.hbm %s1290_s4, %s668_s8  ;;  %s516_s30 = int_to_ptr.vmem [resolvable:$true] %s515_s30 }
 0x18b   : > { %s856_s17 = scalar_lea.vmem %s516_s30, 16  ;;  %p1308_p9 = scmp.eq.s32.totalorder %s1050_s25, 3 }
 0x18c   : > { %p857_p8 = scmp.ne.s32.totalorder %s516_s30, %s856_s17  ;;  %s862_s7 = scalar_lea.vmem %s516_s30, 32 }
 0x18d   : > { %p863_p7 = scmp.lt.s32.totalorder %s516_s30, %s516_s30  ;;  %p864_p10 = scmp.lt.s32.totalorder %s862_s7, %s856_s17 }
 0x18e   : > { %p858_p13 = pnand %p857_p8, %p1308_p9 }
 0x18f   : > { %p865_p1 = por %p864_p10, %p863_p7 }
 0x190   : > { %p859_p3 = pneg %p858_p13 }
 0x192   : > { %p866_p0 = pnand %p865_p1, %p859_p3 }
 0x194   : > { %869 = shalt.err (!%p866_p0)
}
 0x195   : > { %s870_s20 = scalar_lea.hbm %s1291_s5, 16  ;;  %p1309_p11 = pmov %p1308_p9 }
 0x196   : > { %p871_p5 = scmp.ne.s32.totalorder %s1291_s5, %s870_s20  ;;  %p876_p6 = scmp.lt.u32.totalorder %s870_s20, %s1291_s5 }
 0x198   : > { %p872_p2 = pnand %p871_p5, %p1309_p11 }
 0x19a   : > { %p873_p4 = pneg %p872_p2 }
 0x19c   : > { %p878_p8 = pnand %p876_p6, %p873_p4 }
 0x19e   : > { %881 = shalt.err (!%p878_p8)
}
 0x19f   : > { %718 = dma.vmem_to_hbm [thread:$0]  (%p1308_p9), %s516_s30, 16, %s1291_s5, [#allocation11]  }
 0x1a0   : > { %s501_s17 = sshll.u32 %s1183_s27, 4  ;;  %s488_s7 = scalar_lea.sflag [#allocation6], %s1167_s12  ;;  %s1221_s17 = int_to_ptr.vmem [resolvable:$true] %s501_s17 }
 0x1a1   : > { %s882_s11 = scalar_lea.vmem %s1221_s17, 256  ;;  %s990_s29 = smov [#allocation9]  }
 0x1a2   : > { %p883_p13 = scmp.ne.s32.totalorder %s1221_s17, %s882_s11  ;;  %s886_s20 = sshll.u32 %s990_s29, 4  ;;  %s887_s20 = int_to_ptr.vmem [resolvable:$false] %s886_s20 }
 0x1a3   : > { %s888_s26 = scalar_lea.vmem %s887_s20, 512  ;;  %p889_p10 = scmp.lt.s32.totalorder %s1221_s17, %s887_s20 }
 0x1a4   : > { %p884_p3 = pnand %p883_p13, %p1116_p12  ;;  %p890_p1 = scmp.lt.s32.totalorder %s888_s26, %s882_s11 }
 0x1a6   : > { %p885_p7 = pneg %p884_p3  ;;  %p891_p0 = por %p890_p1, %p889_p10 }
 0x1a8   : > { %p892_p5 = pnand %p891_p0, %p885_p7 }
 0x1aa   : > { %895 = shalt.err (!%p892_p5)
}
 0x1ab   : > { %s896_s27 = scalar_lea.hbm %s1200_s18, 256  ;;  %s900_s10 = scalar_lea.hbm %s1290_s4, 1024 }
 0x1ac   : > { %p897_p11 = scmp.ne.s32.totalorder %s1200_s18, %s896_s27  ;;  %p901_p6 = scmp.lt.u32.totalorder %s1200_s18, %s1290_s4 }
 0x1ad   : > { %p902_p8 = scmp.lt.u32.totalorder %s900_s10, %s896_s27  ;;  %p904_p13 = scmp.lt.u32.totalorder %s896_s27, %s1200_s18 }
 0x1ae   : > { %p898_p2 = pnand %p897_p11, %p1116_p12 }
 0x1af   : > { %p903_p9 = por %p902_p8, %p901_p6 }
 0x1b0   : > { %p899_p4 = pneg %p898_p2 }
 0x1b1   : > { %p905_p3 = por %p904_p13, %p903_p9 }
 0x1b3   : > { %p906_p7 = pnand %p905_p3, %p899_p4 }
 0x1b5   : > { %909 = shalt.err (!%p906_p7)
}
 0x1b6   : > { %s991_s16 = smov 64   ;;  %s992_s11 = smov 4  }
 0x1b7   : > { %716 = dma.vmem_to_hbm [thread:$0]  (%p1116_p12), %s1221_s17, 256, %s1200_s18, %s488_s7, %s991_s16, %s991_s16, %s992_s11  }
 0x1b8   : > { %s993_s29 = smov [#allocation12]   ;;  %p1310_p1 = scmp.eq.s32.totalorder %s1050_s25, 3 }
 0x1b9   : > { %s526_s20 = sshll.u32 %s993_s29, 4  ;;  %s527_s20 = int_to_ptr.vmem [resolvable:$true] %s526_s20 }
 0x1ba   : > { %s910_s26 = scalar_lea.vmem %s527_s20, 16  ;;  %s916_s27 = scalar_lea.vmem %s527_s20, 32 }
 0x1bb   : > { %p911_p10 = scmp.ne.s32.totalorder %s527_s20, %s910_s26  ;;  %p917_p11 = scmp.lt.s32.totalorder %s527_s20, %s527_s20 }
 0x1bc   : > { %p918_p2 = scmp.lt.s32.totalorder %s916_s27, %s910_s26 }
 0x1bd   : > { %p912_p0 = pnand %p911_p10, %p1310_p1 }
 0x1be   : > { %p919_p4 = por %p918_p2, %p917_p11 }
 0x1bf   : > { %p913_p5 = pneg %p912_p0 }
 0x1c1   : > { %p920_p6 = pnand %p919_p4, %p913_p5 }
 0x1c3   : > { %923 = shalt.err (!%p920_p6)
}
 0x1c4   : > { %s924_s14 = scalar_lea.hbm %s1292_s6, 16  ;;  %p1311_p8 = pmov %p1310_p1 }
 0x1c5   : > { %p925_p12 = scmp.ne.s32.totalorder %s1292_s6, %s924_s14  ;;  %p930_p3 = scmp.lt.u32.totalorder %s924_s14, %s1292_s6 }
 0x1c7   : > { %p926_p9 = pnand %p925_p12, %p1311_p8 }
 0x1c9   : > { %p927_p13 = pneg %p926_p9 }
 0x1cb   : > { %p932_p7 = pnand %p930_p3, %p927_p13 }
 0x1cd   : > { %935 = shalt.err (!%p932_p7)
}
 0x1ce   : > { %p1312_p10 = pmov %p1310_p1 }
 0x1d0   : > { %720 = dma.vmem_to_hbm [thread:$0]  (%p1312_p10), %s527_s20, 16, %s1292_s6, [#allocation11]  }
 0x1d1   : > { %961 = dma.done.wait (%p1310_p1), [#allocation11], 32   ;;  %p1313_p0 = pmov %p1310_p1 }
 0x1d3   : > { %963 = vsyncadd (%p1313_p0), [#allocation11], 4294967264 }
 0x1d4 PF: > { %p745_p5 = scmp.ge.s32.totalorder %s982_s24, 2  ;;  %s546_s15 = sand.u32 1, %s970_s21  }
 0x1d5   : > { %p1314_p11 = scmp.ne.s32.totalorder %s1297_s28, 0  ;;  %s547_s16 = scalar_lea.sflag [#allocation6], %s546_s15 }
 0x1d7   : > { %p735_p2 = pnand %p745_p5, %p1314_p11 }
 0x1d9   : > { %965 = dma.done.wait (!%p735_p2), %s547_s16, 256  }
 0x1da   : > { %967 = vsyncadd (!%p735_p2), %s547_s16, 4294967040  ;;  %p22_p4 = scmp.ge.s32.totalorder %s1083_s9, 6   ;;  %s1315_s21 = smov %s974_s22 }
 0x1db   : > { %s1316_s22 = smov %s978_s23  ;;  %s1317_s23 = smov %s1112_s13 }
 0x1dc   : > { %s1318_s24 = smov %s1083_s9  ;;  %24 = sbr.rel (!%p22_p4) target bundleno = 7 (0x7), region = 109 }
 0x1e3   :  { %552 = vsyncpa [#allocation5], 1 }
 0x1e4   :  { %554 = vsyncpa [#allocation5 + $0x1], 1 }
 0x1e5   :  { %555 = vsyncpa [#allocation8], 1 }
 0x1e6   :  { %556 = vsyncpa [#allocation6], 1 }
 0x1e7   :  { %558 = vsyncpa [#allocation6 + $0x1], 1 }
 0x1e8   :  { %559 = vsyncpa [#allocation11], 1 }

</bundles_post_ra>
